<compile_context>
chip_gen: v5e
topology: v5e:2x2
jax: 0.10.0
libtpu: 0.0.40
codegen_flags: <defaults>
</compile_context>

<pallas_src>
import jax
import jax.numpy as jnp
from jax.experimental import pallas as pl
from jax.experimental.pallas import tpu as pltpu


LANE = 128
SUBLANE = 8


def _round_up(x: int, m: int) -> int:
    return ((x + m - 1) // m) * m


def _ceil_div(a: int, b: int) -> int:
    return -(-a // b)


def _vmem_budget_bytes() -> int:
    """~3/4 of physical VMEM (capped), with a conservative fallback."""
    cap = None
    try:
        info = pltpu.get_tpu_info()
        cap = getattr(info, "vmem_capacity_bytes", None)
        if cap is None:
            cap = getattr(info, "vmem_bytes", None)
    except Exception:
        cap = None
    if not cap:
        cap = 64 << 20          # v7x-sized fallback: safe everywhere
    return min(int(cap) * 3 // 4, 100 << 20)


# -----------------------------------------------------------------------------
# Kernel
# -----------------------------------------------------------------------------
def _make_decoder_kernel(n_linear: int, use_layer_norm: bool, matmul_dtype,
                         eps: float = 1e-5):
    """Kernel computing the full MLP (and optional LayerNorm) on one node tile.

    refs = [x_ref, (W_ref, b_ref) * n_linear, (gamma_ref, beta_ref)?, o_ref]
    Weights arrive already in `matmul_dtype`; biases / LN params are f32.
    """

    def kernel(*refs):
        x_ref = refs[0]
        param_refs = refs[1:1 + 2 * n_linear]
        idx = 1 + 2 * n_linear
        if use_layer_norm:
            gamma_ref, beta_ref = refs[idx], refs[idx + 1]
            idx += 2
        o_ref = refs[idx]

        h = x_ref[...]
        for l in range(n_linear):
            w = param_refs[2 * l][...]                       # [in, out]
            b = param_refs[2 * l + 1][...]                   # (1, out) f32
            lhs = h if h.dtype == matmul_dtype else h.astype(matmul_dtype)
            h = jnp.dot(lhs, w, preferred_element_type=jnp.float32) + b
            if l < n_linear - 1:                             # ReLU between layers
                h = jnp.maximum(h, 0.0)

        if use_layer_norm:
            mean = jnp.mean(h, axis=-1, keepdims=True)
            var = jnp.mean((h - mean) ** 2, axis=-1, keepdims=True)
            h = (h - mean) * jax.lax.rsqrt(var + eps)
            h = h * gamma_ref[...] + beta_ref[...]

        o_ref[...] = h.astype(o_ref.dtype)

    return kernel


# -----------------------------------------------------------------------------
# Wrapper
# -----------------------------------------------------------------------------
def _vmem_estimate(tile_n, hidden, out_dim, x_itemsize, out_itemsize,
                   param_bytes):
    x_tile = tile_n * hidden * x_itemsize
    out_tile = tile_n * out_dim * out_itemsize
    # f32 working activations + headroom for matmul staging / unrolled temps
    act = 3 * tile_n * max(hidden, LANE) * 4
    # pipeline double-buffers every input (incl. constant params) and the output
    return 2 * (x_tile + out_tile + param_bytes) + act


def decoder_forward(x, weights, biases, ln_params=None, *,
                    tile_n=1024, matmul_dtype=jnp.bfloat16, out_dtype=None):
    """Pallas implementation of _Decoder.forward.

    x        : [N, hidden_dim]  (f32 or bf16)
    weights  : list of [in, out] matrices (already transposed vs torch Linear)
    biases   : list of [out] vectors
    ln_params: optional (gamma [out], beta [out]) for the final LayerNorm
    out_dtype: output dtype (defaults to x.dtype)
    """
    N, H = x.shape
    n_linear = len(weights)
    out_dim = weights[-1].shape[1]
    use_ln = ln_params is not None
    out_dtype = x.dtype if out_dtype is None else out_dtype

    # ----- parameters (cast weights once, wrapper-side) ----------------------
    w_prepared = [jnp.asarray(w).astype(matmul_dtype) for w in weights]
    b_prepared = [jnp.asarray(b, jnp.float32).reshape(1, -1) for b in biases]
    ln_prepared = None
    if use_ln:
        gamma, beta = ln_params
        ln_prepared = (jnp.asarray(gamma, jnp.float32).reshape(1, -1),
                       jnp.asarray(beta, jnp.float32).reshape(1, -1))

    param_bytes = sum(int(a.size) * a.dtype.itemsize
                      for a in (w_prepared + b_prepared))
    if ln_prepared is not None:
        param_bytes += sum(int(a.size) * a.dtype.itemsize for a in ln_prepared)

    # ----- tile / grid selection ---------------------------------------------
    budget = _vmem_budget_bytes()
    out_itemsize = jnp.dtype(out_dtype).itemsize

    tile_n = max(SUBLANE, min(int(tile_n), _round_up(N, SUBLANE)))
    tile_n = _round_up(tile_n, SUBLANE)
    while (tile_n > SUBLANE and
           _vmem_estimate(tile_n, H, out_dim, x.dtype.itemsize, out_itemsize,
                          param_bytes) > budget):
        tile_n = _round_up(tile_n // 2, SUBLANE)

    # v7x has 2 TensorCores: keep >= 2 grid steps when the node count allows,
    # and keep the step count even when the grid is small so both TCs balance.
    steps = _ceil_div(N, tile_n)
    if steps < 2 and N > SUBLANE:
        tile_n = _round_up(_ceil_div(N, 2), SUBLANE)
        steps = _ceil_div(N, tile_n)
    if 2 < steps <= 8 and steps % 2 == 1:
        t2 = _round_up(_ceil_div(N, steps + 1), SUBLANE)
        if t2 >= SUBLANE and _ceil_div(N, t2) % 2 == 0:
            tile_n = t2
            steps = _ceil_div(N, tile_n)

    grid = (steps,)                      # ragged last block handled by Pallas

    vmem_needed = _vmem_estimate(tile_n, H, out_dim, x.dtype.itemsize,
                                 out_itemsize, param_bytes)
    vmem_limit = min(max(int(vmem_needed * 1.5) + (4 << 20), 32 << 20), budget)

    # ----- specs ---------------------------------------------------------------
    in_specs = [pl.BlockSpec((tile_n, H), lambda i: (i, 0))]   # x: tiled over nodes
    args = [x]
    for w, b in zip(w_prepared, b_prepared):
        in_specs.append(pl.BlockSpec(w.shape, lambda i: (0, 0)))   # resident weight
        in_specs.append(pl.BlockSpec(b.shape, lambda i: (0, 0)))   # resident bias
        args += [w, b]
    if use_ln:
        for p in ln_prepared:
            in_specs.append(pl.BlockSpec(p.shape, lambda i: (0, 0)))
            args.append(p)

    # Real lanes only: last block dim == full array dim, so this is legal and
    # writes 4x fewer bytes than a 128-lane padded output for out_dim=32.
    out_spec = pl.BlockSpec((tile_n, out_dim), lambda i: (i, 0))

    kernel = _make_decoder_kernel(n_linear, use_ln, matmul_dtype)

    y = pl.pallas_call(
        kernel,
        out_shape=jax.ShapeDtypeStruct((N, out_dim), out_dtype),
        grid_spec=pltpu.PrefetchScalarGridSpec(
            num_scalar_prefetch=0,
            grid=grid,
            in_specs=in_specs,
            out_specs=out_spec,
        ),
        compiler_params=pltpu.CompilerParams(
            dimension_semantics=("parallel",),
            vmem_limit_bytes=vmem_limit,
        ),
    )(*args)

    return y


# -----------------------------------------------------------------------------
# Deterministic parameter construction (mirrors _Decoder.__init__ shapes)
# -----------------------------------------------------------------------------
def build_decoder_params(key, hidden_dim, output_dim, num_layers, layer_norm):
    """Returns (weights [in,out], biases [out], ln_params or None)."""
    dims = [(hidden_dim, hidden_dim)] * num_layers + [(hidden_dim, output_dim)]
    weights, biases = [], []
    for din, dout in dims:
        kw, kb, key = jax.random.split(key, 3)
        bound = 1.0 / jnp.sqrt(din)  # torch.nn.Linear default init bounds
        # stored as [in, out]  (== torch weight [out, in] transposed)
        weights.append(jax.random.uniform(kw, (din, dout), jnp.float32, -bound, bound))
        biases.append(jax.random.uniform(kb, (dout,), jnp.float32, -bound, bound))
    ln_params = None
    if layer_norm:
        ln_params = (jnp.ones((output_dim,), jnp.float32),
                     jnp.zeros((output_dim,), jnp.float32))
    return weights, biases, ln_params


def decoder_reference(x, weights, biases, ln_params=None, eps=1e-5):
    """Pure-JAX reference of the same forward pass (f32)."""
    h = x.astype(jnp.float32)
    n = len(weights)
    for i, (w, b) in enumerate(zip(weights, biases)):
        h = h @ w + b
        if i < n - 1:
            h = jnp.maximum(h, 0.0)
    if ln_params is not None:
        gamma, beta = ln_params
        mean = jnp.mean(h, axis=-1, keepdims=True)
        var = jnp.mean((h - mean) ** 2, axis=-1, keepdims=True)
        h = (h - mean) / jnp.sqrt(var + eps) * gamma + beta
    return h


# -----------------------------------------------------------------------------
if __name__ == "__main__":
    # Small, module-consistent shapes: 256 "mesh nodes", hidden_dim=128,
    # num_layers=2 (default), output_dim=32.
    N = 256
    HIDDEN = 128
    OUTPUT = 32
    NUM_LAYERS = 2

    key = jax.random.PRNGKey(0)
    kx, kp = jax.random.split(key)
    x = jax.random.normal(kx, (N, HIDDEN), jnp.float32)

    # --- case 1: no LayerNorm, f32 matmuls (bitwise-comparable path) ---------
    w, b, ln = build_decoder_params(kp, HIDDEN, OUTPUT, NUM_LAYERS, layer_norm=False)
    y_f32 = jax.block_until_ready(
        decoder_forward(x, w, b, ln, tile_n=1024, matmul_dtype=jnp.float32))
    y_ref = decoder_reference(x, w, b, ln)
    assert y_f32.shape == (N, OUTPUT)
    assert jnp.allclose(y_f32, y_ref, atol=1e-4, rtol=1e-4), "f32 mismatch"

    # --- case 2: no LayerNorm, bf16 matmuls (fast path) -----------------------
    y_bf16 = jax.block_until_ready(
        decoder_forward(x, w, b, ln, tile_n=1024, matmul_dtype=jnp.bfloat16))
    assert jnp.allclose(y_bf16, y_ref, atol=5e-2, rtol=5e-2), "bf16 mismatch"

    # --- case 3: LayerNorm enabled --------------------------------------------
    w2, b2, ln2 = build_decoder_params(kp, HIDDEN, OUTPUT, NUM_LAYERS, layer_norm=True)
    y_ln = jax.block_until_ready(
        decoder_forward(x, w2, b2, ln2, tile_n=1024, matmul_dtype=jnp.float32))
    y_ln_ref = decoder_reference(x, w2, b2, ln2)
    assert jnp.allclose(y_ln, y_ln_ref, atol=1e-4, rtol=1e-4), "LN mismatch"

    # --- case 4: bf16 I/O end-to-end (halved HBM bytes) -----------------------
    x_bf16 = x.astype(jnp.bfloat16)
    y_bf16_io = jax.block_until_ready(
        decoder_forward(x_bf16, w, b, ln, tile_n=1024,
                        matmul_dtype=jnp.bfloat16, out_dtype=jnp.bfloat16))
    assert y_bf16_io.dtype == jnp.bfloat16 and y_bf16_io.shape == (N, OUTPUT)
    assert jnp.allclose(y_bf16_io.astype(jnp.float32), y_ref,
                        atol=1.5e-1, rtol=1.5e-1), "bf16 I/O mismatch"

    print("KERNEL_OK")
</pallas_src>

<mosaic_0001>
module attributes {stable_mosaic.version = 11 : i64} {
  func.func @kernel(%arg0: i32, %arg1: memref<128x128xf32, #tpu.memory_space<vmem>>, %arg2: memref<128x128xf32, #tpu.memory_space<vmem>>, %arg3: memref<1x128xf32, #tpu.memory_space<vmem>>, %arg4: memref<128x128xf32, #tpu.memory_space<vmem>>, %arg5: memref<1x128xf32, #tpu.memory_space<vmem>>, %arg6: memref<128x32xf32, #tpu.memory_space<vmem>>, %arg7: memref<1x32xf32, #tpu.memory_space<vmem>>, %arg8: memref<128x32xf32, #tpu.memory_space<vmem>>) attributes {dimension_semantics = [#tpu.dimension_semantics<parallel>], iteration_bounds = array<i64: 2>, scalar_prefetch = 0 : i64, scratch_operands = 0 : i64, tpu.core_type = #tpu.core_type<tc>, window_params = [{transform_indices = @transform_0, window_bounds = array<i64: 128, 128>}, {pipeline_mode = #tpu.pipeline_mode<synchronous>, transform_indices = @transform_1, window_bounds = array<i64: 128, 128>}, {pipeline_mode = #tpu.pipeline_mode<synchronous>, transform_indices = @transform_2, window_bounds = array<i64: 1, 128>}, {pipeline_mode = #tpu.pipeline_mode<synchronous>, transform_indices = @transform_3, window_bounds = array<i64: 128, 128>}, {pipeline_mode = #tpu.pipeline_mode<synchronous>, transform_indices = @transform_4, window_bounds = array<i64: 1, 128>}, {pipeline_mode = #tpu.pipeline_mode<synchronous>, transform_indices = @transform_5, window_bounds = array<i64: 128, 32>}, {pipeline_mode = #tpu.pipeline_mode<synchronous>, transform_indices = @transform_6, window_bounds = array<i64: 1, 32>}, {transform_indices = @transform_7, window_bounds = array<i64: 128, 32>}]} {
    %c0 = arith.constant 0 : index
    %c0_0 = arith.constant 0 : index
    %0 = vector.load %arg1[%c0, %c0_0] : memref<128x128xf32, #tpu.memory_space<vmem>>, vector<128x128xf32>
    %c0_1 = arith.constant 0 : index
    %c0_2 = arith.constant 0 : index
    %1 = vector.load %arg2[%c0_1, %c0_2] : memref<128x128xf32, #tpu.memory_space<vmem>>, vector<128x128xf32>
    %c0_3 = arith.constant 0 : index
    %c0_4 = arith.constant 0 : index
    %2 = vector.load %arg3[%c0_3, %c0_4] : memref<1x128xf32, #tpu.memory_space<vmem>>, vector<1x128xf32>
    %cst = arith.constant dense<0.000000e+00> : vector<128x128xf32>
    %3 = tpu.matmul %0, %1, %cst {dimension_numbers = #tpu.dot_dimension_numbers<[1], [0], [0], [1], [0, 0, 1, 1], [], []>} : vector<128x128xf32>, vector<128x128xf32>, vector<128x128xf32> -> vector<128x128xf32>
    %4 = vector.broadcast %2 : vector<1x128xf32> to vector<128x128xf32>
    %5 = arith.addf %3, %4 : vector<128x128xf32>
    %cst_5 = arith.constant 0.000000e+00 : f32
    %6 = vector.broadcast %cst_5 : f32 to vector<128x128xf32>
    %7 = arith.maximumf %5, %6 : vector<128x128xf32>
    %c0_6 = arith.constant 0 : index
    %c0_7 = arith.constant 0 : index
    %8 = vector.load %arg4[%c0_6, %c0_7] : memref<128x128xf32, #tpu.memory_space<vmem>>, vector<128x128xf32>
    %c0_8 = arith.constant 0 : index
    %c0_9 = arith.constant 0 : index
    %9 = vector.load %arg5[%c0_8, %c0_9] : memref<1x128xf32, #tpu.memory_space<vmem>>, vector<1x128xf32>
    %cst_10 = arith.constant dense<0.000000e+00> : vector<128x128xf32>
    %10 = tpu.matmul %7, %8, %cst_10 {dimension_numbers = #tpu.dot_dimension_numbers<[1], [0], [0], [1], [0, 0, 1, 1], [], []>} : vector<128x128xf32>, vector<128x128xf32>, vector<128x128xf32> -> vector<128x128xf32>
    %11 = vector.broadcast %9 : vector<1x128xf32> to vector<128x128xf32>
    %12 = arith.addf %10, %11 : vector<128x128xf32>
    %cst_11 = arith.constant 0.000000e+00 : f32
    %13 = vector.broadcast %cst_11 : f32 to vector<128x128xf32>
    %14 = arith.maximumf %12, %13 : vector<128x128xf32>
    %c0_12 = arith.constant 0 : index
    %c0_13 = arith.constant 0 : index
    %15 = vector.load %arg6[%c0_12, %c0_13] : memref<128x32xf32, #tpu.memory_space<vmem>>, vector<128x32xf32>
    %c0_14 = arith.constant 0 : index
    %c0_15 = arith.constant 0 : index
    %16 = vector.load %arg7[%c0_14, %c0_15] : memref<1x32xf32, #tpu.memory_space<vmem>>, vector<1x32xf32>
    %cst_16 = arith.constant dense<0.000000e+00> : vector<128x32xf32>
    %17 = tpu.matmul %14, %15, %cst_16 {dimension_numbers = #tpu.dot_dimension_numbers<[1], [0], [0], [1], [0, 0, 1, 1], [], []>} : vector<128x128xf32>, vector<128x32xf32>, vector<128x32xf32> -> vector<128x32xf32>
    %18 = vector.broadcast %16 : vector<1x32xf32> to vector<128x32xf32>
    %19 = arith.addf %17, %18 : vector<128x32xf32>
    %c0_17 = arith.constant 0 : index
    %c0_18 = arith.constant 0 : index
    %20 = vector.load %arg8[%c0_17, %c0_18] : memref<128x32xf32, #tpu.memory_space<vmem>>, vector<128x32xf32>
    tpu.vector_store %arg8[%c0_17, %c0_18], %19 {strides = array<i32>} : memref<128x32xf32, #tpu.memory_space<vmem>>, vector<128x32xf32>,
    return
  }
  func.func @transform_0(%arg0: i32) -> (i32, i32) {
    %c0_i32 = arith.constant 0 : i32
    %c0_i32_0 = arith.constant 0 : i32
    return %arg0, %c0_i32 : i32, i32
  }
  func.func @transform_1(%arg0: i32) -> (i32, i32) {
    %c0_i32 = arith.constant 0 : i32
    %c0_i32_0 = arith.constant 0 : i32
    %c0_i32_1 = arith.constant 0 : i32
    return %c0_i32, %c0_i32_0 : i32, i32
  }
  func.func @transform_2(%arg0: i32) -> (i32, i32) {
    %c0_i32 = arith.constant 0 : i32
    %c0_i32_0 = arith.constant 0 : i32
    %c0_i32_1 = arith.constant 0 : i32
    return %c0_i32, %c0_i32_0 : i32, i32
  }
  func.func @transform_3(%arg0: i32) -> (i32, i32) {
    %c0_i32 = arith.constant 0 : i32
    %c0_i32_0 = arith.constant 0 : i32
    %c0_i32_1 = arith.constant 0 : i32
    return %c0_i32, %c0_i32_0 : i32, i32
  }
  func.func @transform_4(%arg0: i32) -> (i32, i32) {
    %c0_i32 = arith.constant 0 : i32
    %c0_i32_0 = arith.constant 0 : i32
    %c0_i32_1 = arith.constant 0 : i32
    return %c0_i32, %c0_i32_0 : i32, i32
  }
  func.func @transform_5(%arg0: i32) -> (i32, i32) {
    %c0_i32 = arith.constant 0 : i32
    %c0_i32_0 = arith.constant 0 : i32
    %c0_i32_1 = arith.constant 0 : i32
    return %c0_i32, %c0_i32_0 : i32, i32
  }
  func.func @transform_6(%arg0: i32) -> (i32, i32) {
    %c0_i32 = arith.constant 0 : i32
    %c0_i32_0 = arith.constant 0 : i32
    %c0_i32_1 = arith.constant 0 : i32
    return %c0_i32, %c0_i32_0 : i32, i32
  }
  func.func @transform_7(%arg0: i32) -> (i32, i32) {
    %c0_i32 = arith.constant 0 : i32
    %c0_i32_0 = arith.constant 0 : i32
    return %arg0, %c0_i32 : i32, i32
  }
}

</mosaic_0001>

<bundles_post_ra>
// kernel: tpu_custom_call.1
= control target key start
LH: loop header
LB: loop body
LE: loop exit
PB: predicated region body
PF: predicated region fallthrough
CT: control target
= control target key end

     0   :  { %12 = vsyncpa [#allocation3], 0  ;;  %s1266_s0 = inlined_call_operand.hbm [shape: f32[256,128], index: 0, kind: input, shape index: {}]   ;;  %s1267_s1 = inlined_call_operand.vmem [shape: f32[128,128], index: 1, kind: input, shape index: {}]   ;;  %s1268_s2 = inlined_call_operand.vmem [shape: f32[1,128], index: 2, kind: input, shape index: {}]   ;;  %s1269_s3 = inlined_call_operand.hbm [shape: f32[128,128], index: 3, kind: input, shape index: {}]   ;;  %s1270_s4 = inlined_call_operand.vmem [shape: f32[1,128], index: 4, kind: input, shape index: {}]   ;;  %s1271_s5 = inlined_call_operand.vmem [shape: f32[128,32], index: 5, kind: input, shape index: {}]   ;;  %s1272_s6 = inlined_call_operand.vmem [shape: f32[1,32], index: 6, kind: input, shape index: {}]   ;;  %s1273_s7 = inlined_call_operand.vmem [shape: f32[256,32], index: 7, kind: output, shape index: {}]  }
   0x1   :  { %14 = vsyncpa [#allocation3 + $0x1], 0 }
   0x2   :  { %15 = vsyncpa [#allocation5], 0  ;;  %s979_s24 = smov 0   ;;  %s981_s25 = smov 0  }
   0x3   :  { %s983_s26 = smov 0   ;;  %s985_s27 = smov 0  }
   0x4 LB: > { %s1274_s28 = sadd.s32 4294967295, %s934_s27   ;;  %p41_p0 = scmp.ne.s32.totalorder %s926_s25, %s922_s24  ;;  %s934_s27 = sphi %s985_s27, %s1283_s27   ;;  %s930_s26 = sphi %s983_s26, %s1282_s26   ;;  %s926_s25 = sphi %s981_s25, %s1281_s25   ;;  %s922_s24 = sphi %s979_s24, %s1280_s24  }
   0x5   : > { %p1001_p1 = scmp.eq.s32.totalorder %s1274_s28, 0  ;;  %p719_p2 = scmp.ge.s32.totalorder %s934_s27, 1 }
   0x6   : > { %p204_p3 = scmp.lt.s32.totalorder %s934_s27, 3  ;;  %s221_s10 = sshll.u32 %s1269_s3, 4  ;;  %s222_s10 = int_to_ptr.hbm [resolvable:$true] %s221_s10 }
   0x7   : > { %p1009_p4 = por %p1001_p1, %p41_p0  ;;  %s936_s12 = smov [#allocation4]  }
   0x8   : > { %p1016_p5 = pnand %p719_p2, %p204_p3  ;;  %s223_s13 = sshll.u32 %s936_s12, 4  ;;  %s224_s13 = int_to_ptr.vmem [resolvable:$true] %s223_s13 }
   0x9   : > { %s1025_s14 = sadd.s32 1, %s934_s27   ;;  %s937_s15 = smov 128  }
   0xa   : > { %p787_p6 = pneg %p1016_p5  ;;  %s938_s16 = smov 8  }
   0xb   : > { %s25_s17 = ssub.s32 %s934_s27, %s1025_s14  ;;  %s28_s18 = sadd.s32 1, %s930_s26 }
   0xc   : > { %p788_p7 = pnand %p787_p6, %p1001_p1  ;;  %p26_p8 = scmp.eq.s32.totalorder %s25_s17, 0 }
   0xd   : > { %p35_p9 = scmp.ne.s32.totalorder %s930_s26, %s926_s25  ;;  %p36_p10 = scmp.eq.s32.totalorder %s934_s27, 0 }
   0xe   : > { %790 = dma.hbm_to_vmem [thread:$0]  (!%p788_p7), %s222_s10, 2048, %s224_s13, [#allocation5], %s937_s15, %s937_s15, %s938_s16  }
   0xf   : > { %p796_p11 = scmp.lt.s32.totalorder %s934_s27, 2  ;;  %p37_p12 = por %p36_p10, %p35_p9 }
  0x10   : > { %s1038_s19 = scalar_select %p26_p8, %s930_s26, %s28_s18  }
  0x11   : > { %s246_s20 = sand.u32 1, %s930_s26   ;;  %s732_s22 = sshll.u32 %s934_s27, 7 }
  0x12   : > { %s722_s21 = sshll.u32 %s246_s20, 7  ;;  %s255_s8 = scalar_lea.hbm %s1266_s0, %s732_s22 }
  0x13   : > { %s250_s9 = scalar_lea.vmem [#allocation2], %s722_s21  ;;  %s256_s28 = sshll.u32 %s255_s8, 4  ;;  %s257_s28 = int_to_ptr.hbm [resolvable:$true] %s256_s28 }
  0x14   : > { %s258_s12 = sshll.u32 %s250_s9, 4  ;;  %p1045_p13 = pnand %p796_p11, %p37_p12  ;;  %s259_s12 = int_to_ptr.vmem [resolvable:$true] %s258_s12 }
  0x15   : > { %s247_s13 = scalar_lea.sflag [#allocation3], %s246_s20  ;;  %s866_s17 = sshra.s32 %s257_s28, 4  ;;  %s867_s17 = int_to_ptr.hbm [resolvable:$true] %s866_s17 }
  0x16   : > { %s868_s18 = scalar_lea.hbm %s867_s17, 128  ;;  %p870_p2 = pneg %p1045_p13 }
  0x17   : > { %p869_p0 = scmp.ne.s32.totalorder %s867_s17, %s868_s18  ;;  %s873_s23 = scalar_lea.hbm %s1266_s0, 256 }
  0x18   : > { %p874_p7 = scmp.lt.s32.totalorder %s867_s17, %s1266_s0  ;;  %p875_p8 = scmp.lt.s32.totalorder %s873_s23, %s868_s18 }
  0x19   : > { %p871_p3 = pnand %p870_p2, %p869_p0 }
  0x1a   : > { %p876_p9 = por %p875_p8, %p874_p7 }
  0x1b   : > { %p872_p6 = pneg %p871_p3 }
  0x1d   : > { %p877_p10 = pnand %p876_p9, %p872_p6 }
  0x1f   : > { %880 = shalt.err (!%p877_p10)
}
  0x20   : > { %794 = dma.hbm_to_vmem [thread:$0]  (!%p1045_p13), %s257_s28, 2048, %s259_s12, %s247_s13, %s937_s15, %s937_s15, %s938_s16  }
  0x21   : > { %270 = sbr.rel (%p1016_p5) target bundleno = 556 (0x22c), region = 48  ;;  %s272_s20 = sand.u32 (!%p1016_p5), 1, %s926_s25  }
  0x22   : > { %s726_s9 = sshll.u32 (!%p1016_p5), %s272_s20, 7  ;;  %s273_s22 = scalar_lea.sflag (!%p1016_p5), [#allocation3], %s272_s20 }
  0x23   : > { %s1065_s21 = scalar_lea.vmem (!%p1016_p5), [#allocation2], %s726_s9 }
  0x26   : > { %913 = dma.done.wait (%p1009_p4), %s273_s22, 2048  }
  0x27   : > { %915 = vsyncadd (%p1009_p4), %s273_s22, 4294965248 }
  0x28   : > { %917 = dma.done.wait (%p1001_p1), [#allocation5], 2048  }
  0x29   : > { %919 = vsyncadd (%p1001_p1), [#allocation5], 4294965248  ;;  %v351_v0 = vld [vmem:[%s1267_s1 + $0x78] sm:$0xff]  ;;  %v350_v1 = vld [vmem:[%s1267_s1 + $0x70] sm:$0xff]  ;;  %s1279_s9 = sadd.s32 4294967295, %s934_s27   ;;  %vm623_vm0 = vcmask 261120  }
  0x2a   : > { %356 = vmatpush.msra.mxu0 %v351_v0  ;;  %733 = vmatpush.msra.mxu3 %v351_v0  ;;  %v349_v2 = vld [vmem:[%s1267_s1 + $0x68] sm:$0xff]  ;;  %v348_v3 = vld [vmem:[%s1267_s1 + $0x60] sm:$0xff]  ;;  %v347_v4 = vld [vmem:[%s1267_s1 + $0x58] sm:$0xff]  ;;  %s728_s22 = sshll.u32 %s1279_s9, 4 }
  0x2b   : > { %v346_v5 = vld [vmem:[%s1267_s1 + $0x50] sm:$0xff]  ;;  %v345_v6 = vld [vmem:[%s1267_s1 + $0x48] sm:$0xff]  ;;  %v344_v7 = vld [vmem:[%s1267_s1 + $0x40] sm:$0xff]  ;;  %p315_p1 = scmp.lt.s32.totalorder %s728_s22, 31 }
  0x2c   : > { %357 = vmatpush.msra.mxu0 %v350_v1  ;;  %734 = vmatpush.msra.mxu3 %v350_v1  ;;  %v343_v8 = vld [vmem:[%s1267_s1 + $0x38] sm:$0xff]  ;;  %v342_v9 = vld [vmem:[%s1267_s1 + $0x30] sm:$0xff]  ;;  %v341_v10 = vld [vmem:[%s1267_s1 + $0x28] sm:$0xff] }
  0x2d   : > { %v340_v11 = vld [vmem:[%s1267_s1 + $0x20] sm:$0xff]  ;;  %v339_v12 = vld [vmem:[%s1267_s1 + $0x18] sm:$0xff]  ;;  %v338_v13 = vld [vmem:[%s1267_s1 + $0x10] sm:$0xff]  ;;  %s1285_s22 = smov (!%p315_p1, %s728_s22), 31 }
  0x2e   : > { %358 = vmatpush.msra.mxu0 %v349_v2  ;;  %735 = vmatpush.msra.mxu3 %v349_v2  ;;  %v337_v14 = vld [vmem:[%s1267_s1 + $0x8] sm:$0xff]  ;;  %v336_v15 = vld [vmem:[%s1267_s1] sm:$0xff]  ;;  %v322_v18 = vld [vmem:[%s1065_s21 + $0x10] sm:$0xff] }
  0x2f   : > { %v320_v16 = vld [vmem:[%s1065_s21] sm:$0xff]  ;;  %v321_v17 = vld [vmem:[%s1065_s21 + $0x8] sm:$0xff]  ;;  %v323_v20 = vld [vmem:[%s1065_s21 + $0x18] sm:$0xff] }
  0x30   : > { %359 = vmatpush.msra.mxu0 %v348_v3  ;;  %736 = vmatpush.msra.mxu3 %v348_v3  ;;  %v332_v19 = vld [vmem:[%s1065_s21 + $0x60] sm:$0xff]  ;;  %v333_v21 = vld [vmem:[%s1065_s21 + $0x68] sm:$0xff]  ;;  %v334_v23 = vld [vmem:[%s1065_s21 + $0x70] sm:$0xff] }
  0x31   : > { %v324_v22 = vld [vmem:[%s1065_s21 + $0x20] sm:$0xff]  ;;  %v325_v24 = vld [vmem:[%s1065_s21 + $0x28] sm:$0xff]  ;;  %v335_v25 = vld [vmem:[%s1065_s21 + $0x78] sm:$0xff] }
  0x32   : > { %360 = vmatpush.msra.mxu0 %v347_v4  ;;  %737 = vmatpush.msra.mxu3 %v347_v4  ;;  %v326_v26 = vld [vmem:[%s1065_s21 + $0x30] sm:$0xff]  ;;  %v327_v27 = vld [vmem:[%s1065_s21 + $0x38] sm:$0xff]  ;;  %v450_v30 = vld [vmem:[#allocation4 + $0x68] sm:$0xff] }
  0x33   : > { %v452_v28 = vld [vmem:[#allocation4 + $0x78] sm:$0xff]  ;;  %v451_v29 = vld [vmem:[#allocation4 + $0x70] sm:$0xff]  ;;  %v449_v31 = vld [vmem:[#allocation4 + $0x60] sm:$0xff] }
  0x34   : > { %361 = vmatpush.msra.mxu0 %v346_v5  ;;  %738 = vmatpush.msra.mxu3 %v346_v5  ;;  %v328_v32 = vld [vmem:[%s1065_s21 + $0x40] sm:$0xff]  ;;  %v448_v33 = vld [vmem:[#allocation4 + $0x58] sm:$0xff]  ;;  %v447_v34 = vld [vmem:[#allocation4 + $0x50] sm:$0xff] }
  0x35   : > { %457 = vmatpush.msra.mxu1 %v452_v28  ;;  %v446_v35 = vld [vmem:[#allocation4 + $0x48] sm:$0xff]  ;;  %v445_v36 = vld [vmem:[#allocation4 + $0x40] sm:$0xff]  ;;  %v444_v38 = vld [vmem:[#allocation4 + $0x38] sm:$0xff] }
  0x36   : > { %362 = vmatpush.msra.mxu0 %v345_v6  ;;  %739 = vmatpush.msra.mxu3 %v345_v6  ;;  %v329_v37 = vld [vmem:[%s1065_s21 + $0x48] sm:$0xff]  ;;  %v443_v39 = vld [vmem:[#allocation4 + $0x30] sm:$0xff]  ;;  %v441_v41 = vld [vmem:[#allocation4 + $0x20] sm:$0xff] }
  0x37   : > { %458 = vmatpush.msra.mxu1 %v451_v29  ;;  %v442_v40 = vld [vmem:[#allocation4 + $0x28] sm:$0xff]  ;;  %v330_v42 = vld [vmem:[%s1065_s21 + $0x50] sm:$0xff]  ;;  %v440_v43 = vld [vmem:[#allocation4 + $0x18] sm:$0xff] }
  0x38   : > { %363 = vmatpush.msra.mxu0 %v344_v7  ;;  %740 = vmatpush.msra.mxu3 %v344_v7  ;;  %v331_v44 = vld [vmem:[%s1065_s21 + $0x58] sm:$0xff]  ;;  %v439_v45 = vld [vmem:[#allocation4 + $0x10] sm:$0xff]  ;;  %v438_v46 = vld [vmem:[#allocation4 + $0x8] sm:$0xff]  ;;  %s729_s21 = sshll.u32 %s1285_s22, 3 }
  0x39   : > { %459 = vmatpush.msra.mxu1 %v450_v30  ;;  %v437_v47 = vld [vmem:[#allocation4] sm:$0xff]  ;;  %s1219_s12 = scalar_lea.vmem %s1273_s7, %s729_s21 }
  0x3a   : > { %364 = vmatpush.msra.mxu0 %v343_v8  ;;  %741 = vmatpush.msra.mxu3 %v343_v8  ;;  %v1142_v48 = vld [vmem:[%s1268_s2] ss:$0 sm:$0xff] }
  0x3b   : > { %460 = vmatpush.msra.mxu1 %v449_v31 }
  0x3c   : > { %365 = vmatpush.msra.mxu0 %v342_v9  ;;  %742 = vmatpush.msra.mxu3 %v342_v9 }
  0x3d   : > { %461 = vmatpush.msra.mxu1 %v448_v33 }
  0x3e   : > { %366 = vmatpush.msra.mxu0 %v341_v10  ;;  %743 = vmatpush.msra.mxu3 %v341_v10 }
  0x3f   : > { %462 = vmatpush.msra.mxu1 %v447_v34 }
  0x40   : > { %367 = vmatpush.msra.mxu0 %v340_v11  ;;  %744 = vmatpush.msra.mxu3 %v340_v11 }
  0x41   : > { %463 = vmatpush.msra.mxu1 %v446_v35 }
  0x42   : > { %368 = vmatpush.msra.mxu0 %v339_v12  ;;  %745 = vmatpush.msra.mxu3 %v339_v12 }
  0x43   : > { %464 = vmatpush.msra.mxu1 %v445_v36 }
  0x44   : > { %369 = vmatpush.msra.mxu0 %v338_v13  ;;  %746 = vmatpush.msra.mxu3 %v338_v13 }
  0x45   : > { %465 = vmatpush.msra.mxu1 %v444_v38 }
  0x46   : > { %370 = vmatpush.msra.mxu0 %v337_v14  ;;  %747 = vmatpush.msra.mxu3 %v337_v14 }
  0x47   : > { %466 = vmatpush.msra.mxu1 %v443_v39 }
  0x48   : > { %371 = vmatpush.msra.mxu0 %v336_v15  ;;  %748 = vmatpush.msra.mxu3 %v336_v15 }
  0x49   : > { %372 = vmatmul.f32.vlgmr.msra.gmra.mxu0 %v320_v16  ;;  %408 = vmatmul.f32.vlgmr.msra.gmra.mxu3 %v332_v19 }
  0x4a   : > { %749 = vmatpush.msrb.mxu3 %v452_v28  ;;  %467 = vmatpush.msra.mxu1 %v442_v40  ;;  %v549_v28 = vld [vmem:[%s1271_s5 + $0x58] sm:$0xff] }
  0x4c   : > { %750 = vmatpush.msrb.mxu3 %v451_v29  ;;  %468 = vmatpush.msra.mxu1 %v441_v41  ;;  %v548_v29 = vld [vmem:[%s1271_s5 + $0x50] sm:$0xff] }
  0x4e   : > { %751 = vmatpush.msrb.mxu3 %v450_v30  ;;  %469 = vmatpush.msra.mxu1 %v440_v43  ;;  %v547_v30 = vld [vmem:[%s1271_s5 + $0x48] sm:$0xff] }
  0x50   : > { %752 = vmatpush.msrb.mxu3 %v449_v31  ;;  %470 = vmatpush.msra.mxu1 %v439_v45 }
  0x51   : > { %375 = vmatmul.f32.gmra.mxu0 %v321_v17  ;;  %411 = vmatmul.f32.gmra.mxu3 %v333_v21  ;;  %v553_v21 = vld [vmem:[%s1271_s5 + $0x78] sm:$0xff] }
  0x52   : > { %753 = vmatpush.msrb.mxu3 %v448_v33  ;;  %471 = vmatpush.msra.mxu1 %v438_v46  ;;  %v546_v33 = vld [vmem:[%s1271_s5 + $0x40] sm:$0xff] }
  0x53   : > { %558 = vmatpush.msra.mxu2 %v553_v21 }
  0x54   : > { %754 = vmatpush.msrb.mxu3 %v447_v34  ;;  %472 = vmatpush.msra.mxu1 %v437_v47 }
  0x56   : > { %755 = vmatpush.msrb.mxu3 %v446_v35  ;;  %v545_v35 = vld [vmem:[%s1271_s5 + $0x38] sm:$0xff] }
  0x58   : > { %756 = vmatpush.msrb.mxu3 %v445_v36  ;;  %v544_v36 = vld [vmem:[%s1271_s5 + $0x30] sm:$0xff] }
  0x59   : > { %378 = vmatmul.f32.gmra.mxu0 %v322_v18  ;;  %414 = vmatmul.f32.gmra.mxu3 %v334_v23  ;;  %v551_v23 = vld [vmem:[%s1271_s5 + $0x68] sm:$0xff] }
  0x5a   : > { %757 = vmatpush.msrb.mxu3 %v444_v38 }
  0x5c   : > { %758 = vmatpush.msrb.mxu3 %v443_v39 }
  0x5e   : > { %759 = vmatpush.msrb.mxu3 %v442_v40  ;;  %v542_v40 = vld [vmem:[%s1271_s5 + $0x20] sm:$0xff] }
  0x60   : > { %760 = vmatpush.msrb.mxu3 %v441_v41 }
  0x61   : > { %381 = vmatmul.f32.gmra.mxu0 %v323_v20  ;;  %417 = vmatmul.f32.gmra.mxu3 %v335_v25 }
  0x62   : > { %761 = vmatpush.msrb.mxu3 %v440_v43 }
  0x64   : > { %762 = vmatpush.msrb.mxu3 %v439_v45 }
  0x66   : > { %763 = vmatpush.msrb.mxu3 %v438_v46  ;;  %v540_v46 = vld [vmem:[%s1271_s5 + $0x10] sm:$0xff] }
  0x68   : > { %764 = vmatpush.msrb.mxu3 %v437_v47  ;;  %v539_v47 = vld [vmem:[%s1271_s5 + $0x8] sm:$0xff] }
  0x69   : > { %384 = vmatmul.f32.gmra.mxu0 %v324_v22  ;;  %v552_v22 = vld [vmem:[%s1271_s5 + $0x70] sm:$0xff] }
  0x6a   : > { %765 = vmatpush.msra.mxu3 %v553_v21  ;;  %559 = vmatpush.msra.mxu2 %v552_v22 }
  0x6c   : > { %766 = vmatpush.msra.mxu3 %v552_v22  ;;  %560 = vmatpush.msra.mxu2 %v551_v23 }
  0x6e   : > { %767 = vmatpush.msra.mxu3 %v551_v23 }
  0x71   : > { %387 = vmatmul.f32.gmra.mxu0 %v325_v24 }
  0x79   : > { %390 = vmatmul.f32.gmra.mxu0 %v326_v26  ;;  %v550_v26 = vld [vmem:[%s1271_s5 + $0x60] sm:$0xff] }
  0x7a   : > { %561 = vmatpush.msra.mxu2 %v550_v26  ;;  %768 = vmatpush.msra.mxu3 %v550_v26 }
  0x7c   : > { %562 = vmatpush.msra.mxu2 %v549_v28  ;;  %769 = vmatpush.msra.mxu3 %v549_v28 }
  0x7e   : > { %563 = vmatpush.msra.mxu2 %v548_v29  ;;  %770 = vmatpush.msra.mxu3 %v548_v29 }
  0x80   : > { %564 = vmatpush.msra.mxu2 %v547_v30  ;;  %771 = vmatpush.msra.mxu3 %v547_v30 }
  0x81   : > { %393 = vmatmul.f32.gmra.mxu0 %v327_v27 }
  0x82   : > { %565 = vmatpush.msra.mxu2 %v546_v33  ;;  %772 = vmatpush.msra.mxu3 %v546_v33 }
  0x84   : > { %566 = vmatpush.msra.mxu2 %v545_v35  ;;  %773 = vmatpush.msra.mxu3 %v545_v35 }
  0x86   : > { %567 = vmatpush.msra.mxu2 %v544_v36  ;;  %774 = vmatpush.msra.mxu3 %v544_v36 }
  0x89   : > { %396 = vmatmul.f32.gmra.mxu0 %v328_v32 }
  0x91   : > { %399 = vmatmul.f32.gmra.mxu0 %v329_v37  ;;  %v543_v37 = vld [vmem:[%s1271_s5 + $0x28] sm:$0xff] }
  0x92   : > { %568 = vmatpush.msra.mxu2 %v543_v37  ;;  %775 = vmatpush.msra.mxu3 %v543_v37 }
  0x94   : > { %569 = vmatpush.msra.mxu2 %v542_v40  ;;  %776 = vmatpush.msra.mxu3 %v542_v40 }
  0x99   : > { %402 = vmatmul.f32.gmra.mxu0 %v330_v42  ;;  %v541_v42 = vld [vmem:[%s1271_s5 + $0x18] sm:$0xff] }
  0x9a   : > { %570 = vmatpush.msra.mxu2 %v541_v42  ;;  %777 = vmatpush.msra.mxu3 %v541_v42 }
  0x9c   : > { %571 = vmatpush.msra.mxu2 %v540_v46  ;;  %778 = vmatpush.msra.mxu3 %v540_v46 }
  0x9e   : > { %572 = vmatpush.msra.mxu2 %v539_v47  ;;  %779 = vmatpush.msra.mxu3 %v539_v47 }
  0xa1   : > { %405 = vmatmul.f32.gmra.mxu0 %v331_v44 }
  0xc6   : > { %v373_v49 = vpop.f32.mrf.mxu0 }
  0xc7   : > { %v374_v50 = vadd.f32 %v1142_v48, %v373_v49  ;;  %v538_v49 = vld [vmem:[%s1271_s5] sm:$0xff] }
  0xc8   : > { %573 = vmatpush.msra.mxu2 %v538_v49  ;;  %780 = vmatpush.msra.mxu3 %v538_v49 }
  0xc9   : > { %v421_v51 = vmax.f32 %v374_v50, 0.0 }
  0xcb   : > { %473 = vmatmul.f32.vlgmr.msra.gmra.mxu1 %v421_v51 }
  0xcc   : > { %v409_v60 = vpop.f32.mrf.mxu3 }
  0xcd   : > { %v410_v62 = vadd.f32 %v1142_v48, %v409_v60 }
  0xce   : > { %v376_v52 = vpop.f32.mrf.mxu0 }
  0xcf   : > { %v377_v53 = vadd.f32 %v1142_v48, %v376_v52  ;;  %v433_v63 = vmax.f32 %v410_v62, 0.0 }
  0xd1   : > { %v422_v54 = vmax.f32 %v377_v53, 0.0  ;;  %509 = vmatmul.f32.vlgmr.msrb.gmra.mxu3 %v433_v63 }
  0xd3   : > { %476 = vmatmul.f32.gmra.mxu1 %v422_v54 }
  0xd4   : > { %v412_v2 = vpop.f32.mrf.mxu3 }
  0xd5   : > { %v413_v4 = vadd.f32 %v1142_v48, %v412_v2 }
  0xd6   : > { %v379_v55 = vpop.f32.mrf.mxu0 }
  0xd7   : > { %v380_v56 = vadd.f32 %v1142_v48, %v379_v55  ;;  %v434_v5 = vmax.f32 %v413_v4, 0.0 }
  0xd9   : > { %v423_v57 = vmax.f32 %v380_v56, 0.0  ;;  %512 = vmatmul.f32.gmra.mxu3 %v434_v5 }
  0xdb   : > { %479 = vmatmul.f32.gmra.mxu1 %v423_v57 }
  0xdc   : > { %v415_v8 = vpop.f32.mrf.mxu3 }
  0xdd   : > { %v416_v10 = vadd.f32 %v1142_v48, %v415_v8 }
  0xde   : > { %v382_v58 = vpop.f32.mrf.mxu0 }
  0xdf   : > { %v383_v59 = vadd.f32 %v1142_v48, %v382_v58  ;;  %v435_v11 = vmax.f32 %v416_v10, 0.0 }
  0xe1   : > { %v424_v61 = vmax.f32 %v383_v59, 0.0  ;;  %515 = vmatmul.f32.gmra.mxu3 %v435_v11 }
  0xe3   : > { %482 = vmatmul.f32.gmra.mxu1 %v424_v61 }
  0xe4   : > { %v418_v14 = vpop.f32.mrf.mxu3 }
  0xe5   : > { %v419_v16 = vadd.f32 %v1142_v48, %v418_v14 }
  0xe6   : > { %v385_v0 = vpop.f32.mrf.mxu0 }
  0xe7   : > { %v386_v1 = vadd.f32 %v1142_v48, %v385_v0  ;;  %v436_v17 = vmax.f32 %v419_v16, 0.0 }
  0xe9   : > { %v425_v3 = vmax.f32 %v386_v1, 0.0  ;;  %518 = vmatmul.f32.gmra.mxu3 %v436_v17 }
  0xeb   : > { %485 = vmatmul.f32.gmra.mxu1 %v425_v3 }
  0xee   : > { %v388_v6 = vpop.f32.mrf.mxu0 }
  0xef   : > { %v389_v7 = vadd.f32 %v1142_v48, %v388_v6 }
  0xf1   : > { %v426_v9 = vmax.f32 %v389_v7, 0.0 }
  0xf3   : > { %488 = vmatmul.f32.gmra.mxu1 %v426_v9 }
  0xf6   : > { %v391_v12 = vpop.f32.mrf.mxu0 }
  0xf7   : > { %v392_v13 = vadd.f32 %v1142_v48, %v391_v12 }
  0xf9   : > { %v427_v15 = vmax.f32 %v392_v13, 0.0 }
  0xfb   : > { %491 = vmatmul.f32.gmra.mxu1 %v427_v15 }
  0xfe   : > { %v394_v18 = vpop.f32.mrf.mxu0 }
  0xff   : > { %v395_v19 = vadd.f32 %v1142_v48, %v394_v18 }
 0x101   : > { %v428_v20 = vmax.f32 %v395_v19, 0.0 }
 0x103   : > { %494 = vmatmul.f32.gmra.mxu1 %v428_v20 }
 0x106   : > { %v397_v24 = vpop.f32.mrf.mxu0 }
 0x107   : > { %v398_v25 = vadd.f32 %v1142_v48, %v397_v24 }
 0x109   : > { %v429_v27 = vmax.f32 %v398_v25, 0.0 }
 0x10b   : > { %497 = vmatmul.f32.gmra.mxu1 %v429_v27 }
 0x10e   : > { %v400_v31 = vpop.f32.mrf.mxu0 }
 0x10f   : > { %v401_v32 = vadd.f32 %v1142_v48, %v400_v31 }
 0x111   : > { %v430_v34 = vmax.f32 %v401_v32, 0.0 }
 0x113   : > { %500 = vmatmul.f32.gmra.mxu1 %v430_v34  ;;  %v835_v34 = vld [vmem:[%s1272_s6] ss:$0 sm:$0xff] }
 0x116   : > { %v403_v38 = vpop.f32.mrf.mxu0 }
 0x117   : > { %v404_v39 = vadd.f32 %v1142_v48, %v403_v38 }
 0x119   : > { %v431_v41 = vmax.f32 %v404_v39, 0.0 }
 0x11b   : > { %503 = vmatmul.f32.gmra.mxu1 %v431_v41 }
 0x11e   : > { %v406_v43 = vpop.f32.mrf.mxu0 }
 0x11f   : > { %v407_v44 = vadd.f32 %v1142_v48, %v406_v43  ;;  %v834_v48 = vld [vmem:[%s1270_s4] ss:$0 sm:$0xff] }
 0x121   : > { %v432_v45 = vmax.f32 %v407_v44, 0.0 }
 0x123   : > { %506 = vmatmul.f32.gmra.mxu1 %v432_v45 }
 0x148   : > { %v474_v50 = vpop.f32.mrf.mxu1 }
 0x149   : > { %v475_v51 = vadd.f32 %v834_v48, %v474_v50 }
 0x14b   : > { %v522_v52 = vmax.f32 %v475_v51, 0.0 }
 0x14d   : > { %574 = vmatmul.f32.vlgmr.msra.gmra.mxu2 %v522_v52 }
 0x150   : > { %v477_v53 = vpop.f32.mrf.mxu1 }
 0x151   : > { %v478_v54 = vadd.f32 %v834_v48, %v477_v53 }
 0x153   : > { %v523_v55 = vmax.f32 %v478_v54, 0.0 }
 0x154   : > { %v510_v63 = vpop.f32.mrf.mxu3 }
 0x155   : > { %577 = vmatmul.f32.gmra.mxu2 %v523_v55  ;;  %v511_v1 = vadd.f32 %v834_v48, %v510_v63 }
 0x157   : > { %v534_v3 = vmax.f32 %v511_v1, 0.0 }
 0x158   : > { %v480_v56 = vpop.f32.mrf.mxu1 }
 0x159   : > { %v481_v57 = vadd.f32 %v834_v48, %v480_v56  ;;  %610 = vmatmul.f32.vlgmr.msra.gmra.mxu3 %v534_v3 }
 0x15b   : > { %v524_v58 = vmax.f32 %v481_v57, 0.0 }
 0x15c   : > { %v513_v5 = vpop.f32.mrf.mxu3 }
 0x15d   : > { %580 = vmatmul.f32.gmra.mxu2 %v524_v58  ;;  %v514_v7 = vadd.f32 %v834_v48, %v513_v5 }
 0x15f   : > { %v535_v9 = vmax.f32 %v514_v7, 0.0 }
 0x160   : > { %v483_v59 = vpop.f32.mrf.mxu1 }
 0x161   : > { %v484_v60 = vadd.f32 %v834_v48, %v483_v59  ;;  %613 = vmatmul.f32.gmra.mxu3 %v535_v9 }
 0x163   : > { %v525_v61 = vmax.f32 %v484_v60, 0.0 }
 0x164   : > { %v516_v11 = vpop.f32.mrf.mxu3 }
 0x165   : > { %583 = vmatmul.f32.gmra.mxu2 %v525_v61  ;;  %v517_v13 = vadd.f32 %v834_v48, %v516_v11 }
 0x167   : > { %v536_v15 = vmax.f32 %v517_v13, 0.0 }
 0x168   : > { %v486_v62 = vpop.f32.mrf.mxu1 }
 0x169   : > { %v487_v0 = vadd.f32 %v834_v48, %v486_v62  ;;  %616 = vmatmul.f32.gmra.mxu3 %v536_v15 }
 0x16b   : > { %v526_v2 = vmax.f32 %v487_v0, 0.0 }
 0x16c   : > { %v519_v17 = vpop.f32.mrf.mxu3 }
 0x16d   : > { %586 = vmatmul.f32.gmra.mxu2 %v526_v2  ;;  %v520_v19 = vadd.f32 %v834_v48, %v519_v17 }
 0x16f   : > { %v537_v21 = vmax.f32 %v520_v19, 0.0 }
 0x170   : > { %v489_v4 = vpop.f32.mrf.mxu1 }
 0x171   : > { %v490_v6 = vadd.f32 %v834_v48, %v489_v4  ;;  %619 = vmatmul.f32.gmra.mxu3 %v537_v21 }
 0x173   : > { %v527_v8 = vmax.f32 %v490_v6, 0.0 }
 0x175   : > { %589 = vmatmul.f32.gmra.mxu2 %v527_v8 }
 0x178   : > { %v492_v10 = vpop.f32.mrf.mxu1 }
 0x179   : > { %v493_v12 = vadd.f32 %v834_v48, %v492_v10 }
 0x17b   : > { %v528_v14 = vmax.f32 %v493_v12, 0.0 }
 0x17d   : > { %592 = vmatmul.f32.gmra.mxu2 %v528_v14 }
 0x180   : > { %v495_v16 = vpop.f32.mrf.mxu1 }
 0x181   : > { %v496_v18 = vadd.f32 %v834_v48, %v495_v16 }
 0x183   : > { %v529_v20 = vmax.f32 %v496_v18, 0.0 }
 0x185   : > { %595 = vmatmul.f32.gmra.mxu2 %v529_v20 }
 0x188   : > { %v498_v22 = vpop.f32.mrf.mxu1 }
 0x189   : > { %v499_v23 = vadd.f32 %v834_v48, %v498_v22 }
 0x18b   : > { %v530_v24 = vmax.f32 %v499_v23, 0.0 }
 0x18d   : > { %598 = vmatmul.f32.gmra.mxu2 %v530_v24 }
 0x190   : > { %v501_v25 = vpop.f32.mrf.mxu1 }
 0x191   : > { %v502_v26 = vadd.f32 %v834_v48, %v501_v25 }
 0x193   : > { %v531_v27 = vmax.f32 %v502_v26, 0.0 }
 0x195   : > { %601 = vmatmul.f32.gmra.mxu2 %v531_v27 }
 0x198   : > { %v504_v28 = vpop.f32.mrf.mxu1 }
 0x199   : > { %v505_v29 = vadd.f32 %v834_v48, %v504_v28 }
 0x19b   : > { %v532_v30 = vmax.f32 %v505_v29, 0.0 }
 0x19d   : > { %604 = vmatmul.f32.gmra.mxu2 %v532_v30 }
 0x1a0   : > { %v507_v31 = vpop.f32.mrf.mxu1 }
 0x1a1   : > { %v508_v32 = vadd.f32 %v834_v48, %v507_v31 }
 0x1a3   : > { %v533_v33 = vmax.f32 %v508_v32, 0.0 }
 0x1a5   : > { %607 = vmatmul.f32.gmra.mxu2 %v533_v33 }
 0x1d0   : > { %v575_v35 = vpop.f32.mrf.mxu2 }
 0x1d1   : > { %v576_v36 = vadd.f32 %v835_v34, %v575_v35 }
 0x1d3   : > { %624 = vst.msk [vmem:[%s1219_s12] sm:$0xff] %vm623_vm0, %v576_v36 }
 0x1d8   : > { %v578_v37 = vpop.f32.mrf.mxu2 }
 0x1d9   : > { %v579_v38 = vadd.f32 %v835_v34, %v578_v37 }
 0x1db   : > { %625 = vst.msk [vmem:[%s1219_s12 + $0x8] sm:$0xff] %vm623_vm0, %v579_v38 }
 0x1dc   : > { %v611_v44 = vpop.f32.mrf.mxu3 }
 0x1dd   : > { %v612_v46 = vadd.f32 %v835_v34, %v611_v44 }
 0x1df   : > { %636 = vst.msk [vmem:[%s1219_s12 + $0x60] sm:$0xff] %vm623_vm0, %v612_v46 }
 0x1e0   : > { %v581_v39 = vpop.f32.mrf.mxu2 }
 0x1e1   : > { %v582_v40 = vadd.f32 %v835_v34, %v581_v39 }
 0x1e3   : > { %626 = vst.msk [vmem:[%s1219_s12 + $0x10] sm:$0xff] %vm623_vm0, %v582_v40 }
 0x1e4   : > { %v614_v49 = vpop.f32.mrf.mxu3 }
 0x1e5   : > { %v615_v50 = vadd.f32 %v835_v34, %v614_v49 }
 0x1e7   : > { %637 = vst.msk [vmem:[%s1219_s12 + $0x68] sm:$0xff] %vm623_vm0, %v615_v50 }
 0x1e8   : > { %v584_v41 = vpop.f32.mrf.mxu2 }
 0x1e9   : > { %v585_v42 = vadd.f32 %v835_v34, %v584_v41 }
 0x1eb   : > { %627 = vst.msk [vmem:[%s1219_s12 + $0x18] sm:$0xff] %vm623_vm0, %v585_v42 }
 0x1ec   : > { %v617_v52 = vpop.f32.mrf.mxu3 }
 0x1ed   : > { %v618_v54 = vadd.f32 %v835_v34, %v617_v52 }
 0x1ef   : > { %638 = vst.msk [vmem:[%s1219_s12 + $0x70] sm:$0xff] %vm623_vm0, %v618_v54 }
 0x1f0   : > { %v587_v43 = vpop.f32.mrf.mxu2 }
 0x1f1   : > { %v588_v45 = vadd.f32 %v835_v34, %v587_v43 }
 0x1f3   : > { %628 = vst.msk [vmem:[%s1219_s12 + $0x20] sm:$0xff] %vm623_vm0, %v588_v45 }
 0x1f4   : > { %v620_v56 = vpop.f32.mrf.mxu3 }
 0x1f5   : > { %v621_v58 = vadd.f32 %v835_v34, %v620_v56 }
 0x1f7   : > { %639 = vst.msk [vmem:[%s1219_s12 + $0x78] sm:$0xff] %vm623_vm0, %v621_v58 }
 0x1f8   : > { %v590_v47 = vpop.f32.mrf.mxu2 }
 0x1f9   : > { %v591_v48 = vadd.f32 %v835_v34, %v590_v47 }
 0x1fb   : > { %629 = vst.msk [vmem:[%s1219_s12 + $0x28] sm:$0xff] %vm623_vm0, %v591_v48 }
 0x200   : > { %v593_v51 = vpop.f32.mrf.mxu2 }
 0x201   : > { %v594_v53 = vadd.f32 %v835_v34, %v593_v51 }
 0x203   : > { %630 = vst.msk [vmem:[%s1219_s12 + $0x30] sm:$0xff] %vm623_vm0, %v594_v53 }
 0x208   : > { %v596_v55 = vpop.f32.mrf.mxu2 }
 0x209   : > { %v597_v57 = vadd.f32 %v835_v34, %v596_v55 }
 0x20b   : > { %631 = vst.msk [vmem:[%s1219_s12 + $0x38] sm:$0xff] %vm623_vm0, %v597_v57 }
 0x210   : > { %v599_v59 = vpop.f32.mrf.mxu2 }
 0x211   : > { %v600_v60 = vadd.f32 %v835_v34, %v599_v59 }
 0x213   : > { %632 = vst.msk [vmem:[%s1219_s12 + $0x40] sm:$0xff] %vm623_vm0, %v600_v60 }
 0x218   : > { %v602_v61 = vpop.f32.mrf.mxu2 }
 0x219   : > { %v603_v62 = vadd.f32 %v835_v34, %v602_v61 }
 0x21b   : > { %633 = vst.msk [vmem:[%s1219_s12 + $0x48] sm:$0xff] %vm623_vm0, %v603_v62 }
 0x220   : > { %v605_v63 = vpop.f32.mrf.mxu2 }
 0x221   : > { %v606_v0 = vadd.f32 %v835_v34, %v605_v63 }
 0x223   : > { %634 = vst.msk [vmem:[%s1219_s12 + $0x50] sm:$0xff] %vm623_vm0, %v606_v0 }
 0x228   : > { %v608_v1 = vpop.f32.mrf.mxu2 }
 0x229   : > { %v609_v2 = vadd.f32 %v835_v34, %v608_v1 }
 0x22b   : > { %635 = vst.msk [vmem:[%s1219_s12 + $0x58] sm:$0xff] %vm623_vm0, %v609_v2 }
 0x22c PF: > { %p18_p4 = scmp.ge.s32.totalorder %s1025_s14, 4   ;;  %s1280_s24 = smov %s926_s25 }
 0x22d   : > { %s1281_s25 = smov %s930_s26  ;;  %s1282_s26 = smov %s1038_s19 }
 0x22e   : > { %s1283_s27 = smov %s1025_s14  ;;  %20 = sbr.rel (!%p18_p4) target bundleno = 4 (0x4), region = 92 }
 0x233   :  { %662 = vsyncpa [#allocation3], 1 }
 0x234   :  { %664 = vsyncpa [#allocation3 + $0x1], 1 }
 0x235   :  { %665 = vsyncpa [#allocation5], 1 }

</bundles_post_ra>
